<compile_context>
chip_gen: v7x
topology: tpu7x:2x2x1
jax: 0.10.0
libtpu: 0.0.40
codegen_flags: <defaults>
</compile_context>

<pallas_src>
import functools
import math

import jax
import jax.numpy as jnp
from jax.experimental import pallas as pl
from jax.experimental.pallas import tpu as pltpu

_LN2 = math.log(2.0)


def _laplace_nll_partial_kernel(pred_ref, tgt_ref, out_ref, *, d, eps, n_rows):
    """Writes this row-tile's partial sum of log(scale) + |t - loc|/scale.

    The ln(2)-per-element term is hoisted and added once in the wrapper.
    """
    tm = pred_ref.shape[0]

    # Cast only after the block is in VMEM -> HBM traffic stays at native width.
    pred = pred_ref[...].astype(jnp.float32)
    tgt = tgt_ref[...].astype(jnp.float32)

    loc = pred[:, :d]
    scale = jnp.maximum(pred[:, d:], jnp.float32(eps))   # scale.clamp_(min=eps)

    nll = jnp.log(scale) + jnp.abs(tgt - loc) / scale

    # Mask rows past the true row count (only the last grid tile can be ragged;
    # padded rows may contain arbitrary data, jnp.where selects them away).
    row = pl.program_id(0) * tm + jax.lax.broadcasted_iota(jnp.int32, nll.shape, 0)
    nll = jnp.where(row < n_rows, nll, 0.0)

    out_ref[0, 0] = jnp.sum(nll)


def laplace_nll_loss(pred, target, eps=1e-6, reduction="mean",
                     target_block_bytes=2 << 20):
    """JAX/Pallas equivalent of LaplaceNLLLoss.forward.

    pred:   (..., 2*D) float array  (loc | scale along the last dim)
    target: (..., D)   float array
    """
    if reduction not in ("mean", "sum", "none"):
        raise ValueError(f"Unsupported reduction mode: {reduction}")

    d2 = pred.shape[-1]
    assert d2 % 2 == 0, "last dim of pred must be even (loc|scale chunks)"
    d = d2 // 2
    assert target.shape[-1] == d
    assert pred.shape[:-1] == target.shape[:-1]

    if reduction == "none":
        # TODO(synk): 'none' reduction would need an elementwise-output kernel;
        # provided here via a plain-JAX fallback of the same math.
        loc = pred[..., :d].astype(jnp.float32)
        scale = jnp.maximum(pred[..., d:].astype(jnp.float32), eps)
        return jnp.log(2.0 * scale) + jnp.abs(target.astype(jnp.float32) - loc) / scale

    # Free reshapes (merge leading dims only; no copy, no slice, no cast).
    pred2 = pred.reshape(-1, d2)
    tgt2 = target.reshape(-1, d)
    n_rows = pred2.shape[0]

    # Row tile: ~target_block_bytes of pred per block, multiple of 8 sublanes.
    pred_row_bytes = d2 * pred2.dtype.itemsize
    tm = max(8, min(8192, target_block_bytes // max(pred_row_bytes, 1)))
    tm = (tm // 8) * 8
    if n_rows <= tm:
        tm = n_rows                      # single full-extent block
        grid = (1,)
    else:
        grid = (pl.cdiv(n_rows, tm),)    # ragged tail handled by in-kernel mask
    num_tiles = grid[0]

    partials = pl.pallas_call(
        functools.partial(_laplace_nll_partial_kernel,
                          d=d, eps=float(eps), n_rows=n_rows),
        out_shape=jax.ShapeDtypeStruct((num_tiles, 1), jnp.float32),
        grid=grid,
        in_specs=[pl.BlockSpec((tm, d2), lambda i: (i, 0)),
                  pl.BlockSpec((tm, d), lambda i: (i, 0))],
        out_specs=pl.BlockSpec((1, 1), lambda i: (i, 0),
                               memory_space=pltpu.SMEM),
        compiler_params=pltpu.CompilerParams(
            dimension_semantics=("parallel",)),
    )(pred2, tgt2)

    n_elems = n_rows * d
    total = jnp.sum(partials) + jnp.float32(n_elems) * jnp.float32(_LN2)
    if reduction == "mean":
        return total / jnp.float32(n_elems)
    return total                        # "sum"


def _reference_nll(pred, target, eps=1e-6):
    d = pred.shape[-1] // 2
    loc, scale = pred[..., :d], pred[..., d:]
    scale = jnp.maximum(scale, eps)
    return jnp.log(2.0 * scale) + jnp.abs(target - loc) / scale


if __name__ == "__main__":
    key = jax.random.PRNGKey(0)
    k1, k2, k3, k4 = jax.random.split(key, 4)

    # Small shapes consistent with the module: batch=2, seq=8, hidden D=32.
    B, S, D = 2, 8, 32
    pred = jax.random.normal(k1, (B, S, 2 * D), dtype=jnp.float32)
    target = jax.random.normal(k2, (B, S, D), dtype=jnp.float32)

    out = jax.block_until_ready(laplace_nll_loss(pred, target, reduction="mean"))
    ref = _reference_nll(pred, target).mean()
    assert jnp.allclose(out, ref, rtol=1e-5, atol=1e-5), (out, ref)

    out_sum = jax.block_until_ready(laplace_nll_loss(pred, target, reduction="sum"))
    ref_sum = _reference_nll(pred, target).sum()
    assert jnp.allclose(out_sum, ref_sum, rtol=1e-5, atol=1e-4), (out_sum, ref_sum)

    # Exercise the multi-tile + ragged-last-tile path with a small block size.
    pred_b = jax.random.normal(k3, (1000, 2 * D), dtype=jnp.float32)
    target_b = jax.random.normal(k4, (1000, D), dtype=jnp.float32)
    out_b = jax.block_until_ready(
        laplace_nll_loss(pred_b, target_b, reduction="mean",
                         target_block_bytes=1 << 16))
    ref_b = _reference_nll(pred_b, target_b).mean()
    assert jnp.allclose(out_b, ref_b, rtol=1e-4, atol=1e-4), (out_b, ref_b)

    print("KERNEL_OK")
</pallas_src>

<mosaic_0001>
module attributes {stable_mosaic.version = 11 : i64} {
  func.func @_laplace_nll_partial_kernel(%arg0: i32, %arg1: memref<16x64xf32, #tpu.memory_space<vmem>>, %arg2: memref<16x32xf32, #tpu.memory_space<vmem>>, %arg3: memref<1x1xf32, #tpu.memory_space<smem>>) attributes {dimension_semantics = [#tpu.dimension_semantics<parallel>], iteration_bounds = array<i64: 1>, scalar_prefetch = 0 : i64, scratch_operands = 0 : i64, tpu.core_type = #tpu.core_type<tc>, window_params = [{transform_indices = @transform_0, window_bounds = array<i64: 16, 64>}, {transform_indices = @transform_1, window_bounds = array<i64: 16, 32>}, {transform_indices = @transform_2, window_bounds = array<i64: 1, 1>}]} {
    %c0 = arith.constant 0 : index
    %c0_0 = arith.constant 0 : index
    %0 = vector.load %arg1[%c0, %c0_0] : memref<16x64xf32, #tpu.memory_space<vmem>>, vector<16x64xf32>
    %c0_1 = arith.constant 0 : index
    %c0_2 = arith.constant 0 : index
    %1 = vector.load %arg2[%c0_1, %c0_2] : memref<16x32xf32, #tpu.memory_space<vmem>>, vector<16x32xf32>
    %2 = vector.extract_strided_slice %0 {offsets = [0, 0], sizes = [16, 32], strides = [1, 1]} : vector<16x64xf32> to vector<16x32xf32>
    %3 = vector.extract_strided_slice %0 {offsets = [0, 32], sizes = [16, 32], strides = [1, 1]} : vector<16x64xf32> to vector<16x32xf32>
    %cst = arith.constant 9.99999997E-7 : f32
    %4 = vector.broadcast %cst : f32 to vector<16x32xf32>
    %5 = arith.maximumf %3, %4 : vector<16x32xf32>
    %6 = math.log %5 : vector<16x32xf32>
    %7 = arith.subf %1, %2 : vector<16x32xf32>
    %8 = math.absf %7 : vector<16x32xf32>
    %9 = arith.divf %8, %5 : vector<16x32xf32>
    %10 = arith.addf %6, %9 : vector<16x32xf32>
    %c16_i32 = arith.constant 16 : i32
    %11 = arith.muli %arg0, %c16_i32 : i32
    %12 = tpu.iota {dimensions = array<i32: 0>} : vector<16x32xi32>
    %13 = vector.broadcast %11 : i32 to vector<16x32xi32>
    %14 = arith.addi %13, %12 : vector<16x32xi32>
    %c16_i32_3 = arith.constant 16 : i32
    %15 = vector.broadcast %c16_i32_3 : i32 to vector<16x32xi32>
    %16 = arith.cmpi slt, %14, %15 : vector<16x32xi32>
    %cst_4 = arith.constant 0.000000e+00 : f32
    %17 = vector.broadcast %cst_4 : f32 to vector<16x32xf32>
    %18 = arith.select %16, %10, %17 : vector<16x32xi1>, vector<16x32xf32>
    %19 = vector.shape_cast %18 : vector<16x32xf32> to vector<1x16x32xf32>
    %cst_5 = arith.constant dense<0.000000e+00> : vector<1xf32>
    %20 = vector.multi_reduction <add>, %19, %cst_5 [1, 2] : vector<1x16x32xf32> to vector<1xf32>
    %21 = vector.shape_cast %20 : vector<1xf32> to vector<1x1x1xf32>
    %22 = vector.extract %21[0, 0, 0] : f32 from vector<1x1x1xf32>
    %c0_6 = arith.constant 0 : index
    %c0_7 = arith.constant 0 : index
    %23 = memref.load %arg3[%c0_6, %c0_7] : memref<1x1xf32, #tpu.memory_space<smem>>
    memref.store %22, %arg3[%c0_6, %c0_7] : memref<1x1xf32, #tpu.memory_space<smem>>
    return
  }
  func.func @transform_0(%arg0: i32) -> (i32, i32) {
    %c0_i32 = arith.constant 0 : i32
    %c0_i32_0 = arith.constant 0 : i32
    return %arg0, %c0_i32 : i32, i32
  }
  func.func @transform_1(%arg0: i32) -> (i32, i32) {
    %c0_i32 = arith.constant 0 : i32
    %c0_i32_0 = arith.constant 0 : i32
    return %arg0, %c0_i32 : i32, i32
  }
  func.func @transform_2(%arg0: i32) -> (i32, i32) {
    %c0_i32 = arith.constant 0 : i32
    %c0_i32_0 = arith.constant 0 : i32
    return %arg0, %c0_i32 : i32, i32
  }
}

</mosaic_0001>

<bundles_post_ra>
// kernel: tpu_custom_call.1
= control target key start
LH: loop header
LB: loop body
LE: loop exit
PB: predicated region body
PF: predicated region fallthrough
CT: control target
= control target key end

     0   :  { %7 = vsyncpa [#allocation3], 0  ;;  %s264_s0 = inlined_call_operand.hbm [shape: f32[16,64], index: 0, kind: input, shape index: {}]   ;;  %s265_s1 = inlined_call_operand.hbm [shape: f32[16,32], index: 1, kind: input, shape index: {}]   ;;  %s266_s2 = inlined_call_operand.hbm [shape: f32[1,1], index: 2, kind: output, shape index: {}]  }
   0x1   :  { %8 = vsyncpa [#allocation6], 0 }
   0x2   :  { %9 = vsyncpa [#allocation4], 0  ;;  %s202_s9 = smov [#allocation2]   ;;  %s142_s13 = scalar_lea.hbm %s264_s0, 256 }
   0x3   :  { %s15_s10 = sshll.u32 %s202_s9, 4  ;;  %p143_p0 = scmp.ne.s32.totalorder %s264_s0, %s142_s13  ;;  %s16_s10 = int_to_ptr.vmem [resolvable:$true] %s15_s10 }
   0x4   :  { %p146_p1 = scmp.lt.u32.totalorder %s142_s13, %s264_s0 }
   0x6   :  { %p148_p2 = pnand %p146_p1, %p143_p0 }
   0x8   :  { %151 = shalt.err (!%p148_p2)
}
   0x9   :  { %s152_s18 = scalar_lea.vmem %s16_s10, 256  ;;  %p157_p4 = scmp.lt.s32.totalorder %s16_s10, %s16_s10 }
   0xa   :  { %p153_p3 = scmp.ne.s32.totalorder %s16_s10, %s152_s18  ;;  %p158_p5 = scmp.lt.s32.totalorder %s152_s18, %s152_s18 }
   0xc   :  { %p159_p6 = por %p158_p5, %p157_p4 }
   0xe   :  { %p160_p7 = pnand %p159_p6, %p153_p3 }
  0x10   :  { %163 = shalt.err (!%p160_p7)
}
  0x11   :  { %s203_s19 = smov 128   ;;  %s204_s20 = smov 8  }
  0x12   :  { %21 = dma.hbm_to_vmem [thread:$0]  %s264_s0, 256, %s16_s10, [#allocation3], %s203_s19, %s203_s19, %s204_s20  }
  0x13   :  { %s205_s23 = smov [#allocation5]   ;;  %s164_s27 = scalar_lea.hbm %s265_s1, 256 }
  0x14   :  { %s27_s24 = sshll.u32 %s205_s23, 4  ;;  %p165_p8 = scmp.ne.s32.totalorder %s265_s1, %s164_s27  ;;  %s28_s24 = int_to_ptr.vmem [resolvable:$true] %s27_s24 }
  0x15   :  { %p168_p9 = scmp.lt.u32.totalorder %s164_s27, %s265_s1 }
  0x17   :  { %p170_p10 = pnand %p168_p9, %p165_p8 }
  0x19   :  { %173 = shalt.err (!%p170_p10)
}
  0x1a   :  { %s174_s4 = scalar_lea.vmem %s28_s24, 256  ;;  %p179_p12 = scmp.lt.s32.totalorder %s28_s24, %s28_s24 }
  0x1b   :  { %p175_p11 = scmp.ne.s32.totalorder %s28_s24, %s174_s4  ;;  %p180_p13 = scmp.lt.s32.totalorder %s174_s4, %s174_s4 }
  0x1d   :  { %p181_p0 = por %p180_p13, %p179_p12 }
  0x1f   :  { %p182_p1 = pnand %p181_p0, %p175_p11 }
  0x21   :  { %185 = shalt.err (!%p182_p1)
}
  0x22   :  { %33 = dma.hbm_to_vmem [thread:$0]  %s265_s1, 256, %s28_s24, [#allocation6], %s203_s19, %s203_s19, %s204_s20  }
  0x23   :  { %196 = dma.done.wait [#allocation3], 256  }
  0x24   :  { %197 = vsyncadd [#allocation3], 4294967040 }
  0x25   :  { %198 = dma.done.wait [#allocation6], 256  }
  0x26   :  { %199 = vsyncadd [#allocation6], 4294967040  ;;  %v40_v0 = vld [vmem:[#allocation2] sm:$0xff]  ;;  %v41_v1 = vld [vmem:[#allocation2 + $0x8] sm:$0xff]  ;;  %s206_s6 = smov 96   ;;  %s207_s1 = smov 32  }
  0x27   :  { %v44_v2 = vmax.f32 %v40_v0, 1e-06  ;;  %v45_v3 = vmax.f32 %v41_v1, 1e-06  ;;  %v42_v5 = vld [vmem:[#allocation5] sm:$0xff]  ;;  %v43_v8 = vld [vmem:[#allocation5 + $0x8] sm:$0xff] }
  0x28   :  { %v50_v6 = vsub.f32 %v42_v5, %v40_v0  ;;  %v51_v9 = vsub.f32 %v43_v8, %v41_v1  ;;  %vm95_vm0 = vcmask 261120   ;;  %s186_s10 = scalar_lea.hbm %s266_s2, 16 }
  0x29   :  { %56 = vrot.lane.b32.xlu0 %v44_v2, %s206_s6  ;;  %p187_p2 = scmp.ne.s32.totalorder %s266_s2, %s186_s10  ;;  %p190_p3 = scmp.lt.u32.totalorder %s186_s10, %s266_s2 }
  0x2a   :  { %v52_v10 = vand.u32 2147483647, %v50_v6  ;;  %v53_v13 = vand.u32 2147483647, %v51_v9 }
  0x2b   :  { %p192_p4 = pnand %p190_p3, %p187_p2 }
  0x2d   :  { %58 = vrot.lane.b32.xlu0 %v45_v3, %s206_s6 }
  0x9b   :  { %v57_v4 = vpop.permute.xlu0 %56 }
  0x9c   :  { %134 = vrcp.f32 %v57_v4 }
  0x9f   :  { %v59_v7 = vpop.permute.xlu0 %58 }
  0xa0   :  { %136 = vrcp.f32 %v59_v7 }
  0xa1   :  { %138 = vlog2.f32 %v44_v2 }
  0xa2   :  { %140 = vlog2.f32 %v45_v3 }
  0xa6   :  { %v135_v11 = vpop.eup %134 }
  0xa7   :  { %v63_v12 = vmul.f32 %v135_v11, %v52_v10 }
  0xa9   :  { %68 = vrot.lane.b32.xlu1 %v63_v12, %s207_s1 }
  0xaa   :  { %v137_v14 = vpop.eup %136 }
  0xab   :  { %v65_v15 = vmul.f32 %v137_v14, %v53_v13  ;;  %v139_v16 = vpop.eup %138 }
  0xac   :  { %v47_v17 = vmul.f32 0.6931472, %v139_v16  ;;  %v141_v18 = vpop.eup %140 }
  0xad   :  { %70 = vrot.lane.b32.xlu1 %v65_v15, %s207_s1  ;;  %v49_v21 = vmul.f32 0.6931472, %v141_v18 }
 0x11b   :  { %v69_v19 = vpop.permute.xlu1 %68 }
 0x11c   :  { %v74_v20 = vadd.f32 %v69_v19, %v47_v17 }
 0x11e   :  { %89 = vrot.lane.b32.xlu0 %v74_v20, %s206_s6 }
 0x11f   :  { %v71_v22 = vpop.permute.xlu1 %70 }
 0x120   :  { %v75_v23 = vadd.f32 %v71_v22, %v49_v21 }
 0x122   :  { %91 = vrot.lane.b32.xlu1 %v75_v23, %s206_s6 }
 0x190   :  { %v90_v24 = vpop.permute.xlu0 %89 }
 0x191   :  { %v96_v26 = vsel %vm95_vm0, %v90_v24, 0.0 }
 0x194   :  { %v92_v25 = vpop.permute.xlu1 %91 }
 0x195   :  { %v97_v27 = vsel %vm95_vm0, %v92_v25, 0.0 }
 0x196   :  { %v98_v28 = vadd.f32 %v97_v27, %v96_v26 }
 0x198   :  { %99 = vadd.xlane.f32.xlu0 %v98_v28 }
 0x225   :  { %v100_v29 = vpop.xlane.xlu0 %99 }
 0x226   :  { %v101_v30 = vrot.slane %v100_v29, 4 }
 0x228   :  { %v102_v31 = vadd.f32 %v101_v30, %v100_v29 }
 0x22a   :  { %v103_v32 = vrot.slane %v102_v31, 2 }
 0x22c   :  { %v104_v33 = vadd.f32 %v103_v32, %v102_v31 }
 0x22e   :  { %v105_v34 = vrot.slane %v104_v33, 1 }
 0x230   :  { %v106_v35 = vadd.f32 %v105_v34, %v104_v33 }
 0x232   :  { %125 = vpush %v106_v35 }
 0x263   :  { %s126_s7 = spop %125 }
 0x264   :  { %109 = sst [smem:[#allocation7]] %s126_s7 }
 0x265   :  { %195 = shalt.err (!%p192_p4)
}
 0x266   :  { %s208_s15 = smov [#allocation7]  }
 0x267   :  { %117 = dma.smem_to_hbm %s208_s15, 16, %s266_s2, [#allocation4]  }
 0x268   :  { %200 = dma.done.wait [#allocation4], 16  }
 0x269   :  { %201 = vsyncadd [#allocation4], 4294967280 }
 0x26a   :  { %121 = sfence }
 0x26b   :  { %122 = vsyncpa [#allocation3], 1 }
 0x26c   :  { %123 = vsyncpa [#allocation6], 1 }
 0x26d   :  { %124 = vsyncpa [#allocation4], 1 }

</bundles_post_ra>
